<compile_context>
chip_gen: v6e
topology: v6e:2x2x1
jax: 0.10.0
libtpu: 0.0.40
codegen_flags: <defaults>
</compile_context>

<pallas_src>
import jax
import jax.numpy as jnp
from jax import lax
from jax.experimental import pallas as pl
from jax.experimental.pallas import tpu as pltpu

EPS = 1e-5


def _ds_conv_block_kernel(p_ref, w_ref, g_ref, b_ref, o_ref):
    # p_ref: (1, Cin*9, L)   im2col patches for one sample, L = Ho*Wo
    # w_ref: (Cout, Cin*9)   flattened conv weight (OIHW, row-major)
    # g_ref, b_ref: (Cout, 1) InstanceNorm affine weight / bias
    # o_ref: (1, Cout, L)
    p = p_ref[0].astype(jnp.float32)                        # (K, L)
    w = w_ref[...].astype(jnp.float32)                      # (Cout, K)

    # stride-2 3x3 conv == contraction over the Cin*9 patch axis (MXU).
    h = jnp.dot(w, p, preferred_element_type=jnp.float32)   # (Cout, L)

    # InstanceNorm2d (training-mode stats), two-pass centered statistics:
    # lane-axis reductions (XLU), biased variance.
    inv_n = 1.0 / h.shape[-1]
    mean = jnp.sum(h, axis=-1, keepdims=True) * inv_n       # (Cout, 1)
    d = h - mean                                            # centered activations
    var = jnp.sum(d * d, axis=-1, keepdims=True) * inv_n    # (Cout, 1)
    scale = g_ref[...] * lax.rsqrt(var + EPS)               # (Cout, 1), EUP rsqrt
    hn = d * scale + b_ref[...]

    # ELU (alpha = 1); exp goes to the EUP slot, min() keeps it overflow-safe.
    out = jnp.where(hn > 0, hn, jnp.exp(jnp.minimum(hn, 0.0)) - 1.0)
    o_ref[0] = out.astype(o_ref.dtype)


def _im2col_3x3_s2(x_nchw):
    """(N, C, H, W) -> (N, C*9, Ho*Wo) patches of the stride-2 / pad-1 3x3 conv.

    Channel-major ordering: row c*9 + (kh*3 + kw) holds input channel c at
    filter offset (kh, kw) — matches weight.reshape(Cout, Cin*9).
    """
    N, C, H, W = x_nchw.shape
    Ho = (H - 1) // 2 + 1
    Wo = (W - 1) // 2 + 1
    xp = jnp.pad(x_nchw, ((0, 0), (0, 0), (1, 1), (1, 1)))
    cols = []
    for kh in range(3):
        for kw in range(3):
            patch = xp[:, :, kh:kh + 2 * Ho:2, kw:kw + 2 * Wo:2]  # (N,C,Ho,Wo)
            cols.append(patch.reshape(N, C, Ho * Wo))
    patches = jnp.stack(cols, axis=2).reshape(N, C * 9, Ho * Wo)
    return patches, Ho, Wo


def downsampling_conv_block(x_nchw, w_oihw, gamma, beta):
    """x: (N,Cin,H,W), w: (Cout,Cin,3,3), gamma/beta: (Cout,) -> (N,Cout,Ho,Wo)."""
    N, Cin, H, W = x_nchw.shape
    Cout = w_oihw.shape[0]

    patches, Ho, Wo = _im2col_3x3_s2(x_nchw)                # (N, Cin*9, L)
    L = Ho * Wo
    K = Cin * 9
    w_flat = w_oihw.reshape(Cout, K).astype(jnp.float32)
    g = gamma.reshape(Cout, 1).astype(jnp.float32)
    b = beta.reshape(Cout, 1).astype(jnp.float32)

    itemsize = jnp.dtype(x_nchw.dtype).itemsize
    cost = pl.CostEstimate(
        flops=int(2 * N * Cout * K * L + 8 * N * Cout * L),
        transcendentals=int(N * Cout * L + N * Cout),
        bytes_accessed=int(
            N * K * L * itemsize + Cout * K * 4 + 2 * Cout * 4
            + N * Cout * L * itemsize),
    )

    out = pl.pallas_call(
        _ds_conv_block_kernel,
        out_shape=jax.ShapeDtypeStruct((N, Cout, L), x_nchw.dtype),
        grid_spec=pltpu.PrefetchScalarGridSpec(
            num_scalar_prefetch=0,
            grid=(N,),
            in_specs=[
                pl.BlockSpec((1, K, L), lambda n: (n, 0, 0)),
                pl.BlockSpec((Cout, K), lambda n: (0, 0)),
                pl.BlockSpec((Cout, 1), lambda n: (0, 0)),
                pl.BlockSpec((Cout, 1), lambda n: (0, 0)),
            ],
            out_specs=pl.BlockSpec((1, Cout, L), lambda n: (n, 0, 0)),
        ),
        compiler_params=pltpu.CompilerParams(
            dimension_semantics=("parallel",)),
        cost_estimate=cost,
    )(patches, w_flat, g, b)

    # (N, Cout, L) -> NCHW: pure reshape, zero data movement.
    return out.reshape(N, Cout, Ho, Wo)


def _reference(x, w, gamma, beta):
    """Pure-JAX reference matching the PyTorch module's forward."""
    y = lax.conv_general_dilated(
        x, w, window_strides=(2, 2), padding=((1, 1), (1, 1)),
        dimension_numbers=("NCHW", "OIHW", "NCHW"),
        precision=lax.Precision.HIGHEST)
    mean = jnp.mean(y, axis=(2, 3), keepdims=True)
    var = jnp.mean((y - mean) ** 2, axis=(2, 3), keepdims=True)
    yn = (y - mean) / jnp.sqrt(var + EPS)
    yn = yn * gamma[None, :, None, None] + beta[None, :, None, None]
    return jnp.where(yn > 0, yn, jnp.exp(jnp.minimum(yn, 0.0)) - 1.0)


if __name__ == "__main__":
    N, Cin, Cout, H, W = 2, 4, 8, 16, 16

    key = jax.random.PRNGKey(0)
    kx, kw, kg, kb = jax.random.split(key, 4)
    x = jax.random.normal(kx, (N, Cin, H, W), jnp.float32)
    # PyTorch-style conv weight (Cout, Cin, 3, 3), bias=False.
    w = jax.random.normal(kw, (Cout, Cin, 3, 3), jnp.float32) / jnp.sqrt(Cin * 9.0)
    gamma = 1.0 + 0.1 * jax.random.normal(kg, (Cout,), jnp.float32)
    beta = 0.1 * jax.random.normal(kb, (Cout,), jnp.float32)

    out = downsampling_conv_block(x, w, gamma, beta)
    out = jax.block_until_ready(out)

    ref = _reference(x, w, gamma, beta)
    assert out.shape == (N, Cout, H // 2, W // 2)
    assert jnp.allclose(out, ref, atol=1e-3, rtol=1e-3), "mismatch vs reference"

    print("KERNEL_OK")
</pallas_src>

<mosaic_0001>
module attributes {stable_mosaic.version = 11 : i64} {
  func.func @_ds_conv_block_kernel(%arg0: i32, %arg1: memref<1x36x64xf32, #tpu.memory_space<vmem>>, %arg2: memref<8x36xf32, #tpu.memory_space<vmem>>, %arg3: memref<8x1xf32, #tpu.memory_space<vmem>>, %arg4: memref<8x1xf32, #tpu.memory_space<vmem>>, %arg5: memref<1x8x64xf32, #tpu.memory_space<vmem>>) attributes {dimension_semantics = [#tpu.dimension_semantics<parallel>], iteration_bounds = array<i64: 2>, scalar_prefetch = 0 : i64, scratch_operands = 0 : i64, tpu.core_type = #tpu.core_type<tc>, window_params = [{transform_indices = @transform_0, window_bounds = array<i64: 1, 36, 64>}, {pipeline_mode = #tpu.pipeline_mode<synchronous>, transform_indices = @transform_1, window_bounds = array<i64: 8, 36>}, {pipeline_mode = #tpu.pipeline_mode<synchronous>, transform_indices = @transform_2, window_bounds = array<i64: 8, 1>}, {pipeline_mode = #tpu.pipeline_mode<synchronous>, transform_indices = @transform_3, window_bounds = array<i64: 8, 1>}, {transform_indices = @transform_4, window_bounds = array<i64: 1, 8, 64>}]} {
    %c0 = arith.constant 0 : index
    %c0_0 = arith.constant 0 : index
    %c0_1 = arith.constant 0 : index
    %0 = vector.load %arg1[%c0, %c0_0, %c0_1] : memref<1x36x64xf32, #tpu.memory_space<vmem>>, vector<1x36x64xf32>
    %1 = vector.shape_cast %0 : vector<1x36x64xf32> to vector<36x64xf32>
    %c0_2 = arith.constant 0 : index
    %c0_3 = arith.constant 0 : index
    %2 = vector.load %arg2[%c0_2, %c0_3] : memref<8x36xf32, #tpu.memory_space<vmem>>, vector<8x36xf32>
    %cst = arith.constant dense<0.000000e+00> : vector<8x64xf32>
    %3 = tpu.matmul %2, %1, %cst {dimension_numbers = #tpu.dot_dimension_numbers<[1], [0], [0], [1], [0, 0, 1, 1], [], []>} : vector<8x36xf32>, vector<36x64xf32>, vector<8x64xf32> -> vector<8x64xf32>
    %cst_4 = arith.constant dense<0.000000e+00> : vector<8xf32>
    %4 = vector.multi_reduction <add>, %3, %cst_4 [1] : vector<8x64xf32> to vector<8xf32>
    %5 = vector.shape_cast %4 : vector<8xf32> to vector<8x1xf32>
    %cst_5 = arith.constant 1.562500e-02 : f32
    %6 = vector.broadcast %cst_5 : f32 to vector<8x1xf32>
    %7 = arith.mulf %5, %6 : vector<8x1xf32>
    %8 = vector.broadcast %7 : vector<8x1xf32> to vector<8x64xf32>
    %9 = arith.subf %3, %8 : vector<8x64xf32>
    %10 = arith.mulf %9, %9 : vector<8x64xf32>
    %cst_6 = arith.constant dense<0.000000e+00> : vector<8xf32>
    %11 = vector.multi_reduction <add>, %10, %cst_6 [1] : vector<8x64xf32> to vector<8xf32>
    %12 = vector.shape_cast %11 : vector<8xf32> to vector<8x1xf32>
    %cst_7 = arith.constant 1.562500e-02 : f32
    %13 = vector.broadcast %cst_7 : f32 to vector<8x1xf32>
    %14 = arith.mulf %12, %13 : vector<8x1xf32>
    %c0_8 = arith.constant 0 : index
    %c0_9 = arith.constant 0 : index
    %15 = vector.load %arg3[%c0_8, %c0_9] : memref<8x1xf32, #tpu.memory_space<vmem>>, vector<8x1xf32>
    %cst_10 = arith.constant 9.99999974E-6 : f32
    %16 = vector.broadcast %cst_10 : f32 to vector<8x1xf32>
    %17 = arith.addf %14, %16 : vector<8x1xf32>
    %18 = math.rsqrt %17 : vector<8x1xf32>
    %19 = arith.mulf %15, %18 : vector<8x1xf32>
    %20 = vector.broadcast %19 : vector<8x1xf32> to vector<8x64xf32>
    %21 = arith.mulf %9, %20 : vector<8x64xf32>
    %c0_11 = arith.constant 0 : index
    %c0_12 = arith.constant 0 : index
    %22 = vector.load %arg4[%c0_11, %c0_12] : memref<8x1xf32, #tpu.memory_space<vmem>>, vector<8x1xf32>
    %23 = vector.broadcast %22 : vector<8x1xf32> to vector<8x64xf32>
    %24 = arith.addf %21, %23 : vector<8x64xf32>
    %cst_13 = arith.constant 0.000000e+00 : f32
    %25 = vector.broadcast %cst_13 : f32 to vector<8x64xf32>
    %26 = arith.cmpf ogt, %24, %25 : vector<8x64xf32>
    %cst_14 = arith.constant 0.000000e+00 : f32
    %27 = vector.broadcast %cst_14 : f32 to vector<8x64xf32>
    %28 = arith.minimumf %24, %27 : vector<8x64xf32>
    %29 = math.exp %28 : vector<8x64xf32>
    %cst_15 = arith.constant 1.000000e+00 : f32
    %30 = vector.broadcast %cst_15 : f32 to vector<8x64xf32>
    %31 = arith.subf %29, %30 : vector<8x64xf32>
    %32 = arith.select %26, %24, %31 : vector<8x64xi1>, vector<8x64xf32>
    %c0_16 = arith.constant 0 : index
    %c0_17 = arith.constant 0 : index
    %c0_18 = arith.constant 0 : index
    %33 = vector.load %arg5[%c0_16, %c0_17, %c0_18] : memref<1x8x64xf32, #tpu.memory_space<vmem>>, vector<1x8x64xf32>
    %34 = vector.shape_cast %33 : vector<1x8x64xf32> to vector<8x64xf32>
    %35 = vector.shape_cast %32 : vector<8x64xf32> to vector<1x8x64xf32>
    tpu.vector_store %arg5[%c0_16, %c0_17, %c0_18], %35 {strides = array<i32>} : memref<1x8x64xf32, #tpu.memory_space<vmem>>, vector<1x8x64xf32>,
    return
  }
  func.func @transform_0(%arg0: i32) -> (i32, i32, i32) {
    %c0_i32 = arith.constant 0 : i32
    %c0_i32_0 = arith.constant 0 : i32
    %c0_i32_1 = arith.constant 0 : i32
    return %arg0, %c0_i32, %c0_i32_0 : i32, i32, i32
  }
  func.func @transform_1(%arg0: i32) -> (i32, i32) {
    %c0_i32 = arith.constant 0 : i32
    %c0_i32_0 = arith.constant 0 : i32
    %c0_i32_1 = arith.constant 0 : i32
    return %c0_i32, %c0_i32_0 : i32, i32
  }
  func.func @transform_2(%arg0: i32) -> (i32, i32) {
    %c0_i32 = arith.constant 0 : i32
    %c0_i32_0 = arith.constant 0 : i32
    %c0_i32_1 = arith.constant 0 : i32
    return %c0_i32, %c0_i32_0 : i32, i32
  }
  func.func @transform_3(%arg0: i32) -> (i32, i32) {
    %c0_i32 = arith.constant 0 : i32
    %c0_i32_0 = arith.constant 0 : i32
    %c0_i32_1 = arith.constant 0 : i32
    return %c0_i32, %c0_i32_0 : i32, i32
  }
  func.func @transform_4(%arg0: i32) -> (i32, i32, i32) {
    %c0_i32 = arith.constant 0 : i32
    %c0_i32_0 = arith.constant 0 : i32
    %c0_i32_1 = arith.constant 0 : i32
    return %arg0, %c0_i32, %c0_i32_0 : i32, i32, i32
  }
}

</mosaic_0001>

<bundles_post_ra>
// kernel: tpu_custom_call.1
= control target key start
LH: loop header
LB: loop body
LE: loop exit
PB: predicated region body
PF: predicated region fallthrough
CT: control target
= control target key end

     0   :  { %9 = vsyncpa [#allocation3], 0  ;;  %s665_s0 = inlined_call_operand.vmem [shape: f32[2,36,64], index: 0, kind: input, shape index: {}]   ;;  %s666_s1 = inlined_call_operand.vmem [shape: f32[8,36], index: 1, kind: input, shape index: {}]   ;;  %s667_s2 = inlined_call_operand.vmem [shape: f32[8,1], index: 2, kind: input, shape index: {}]   ;;  %s668_s3 = inlined_call_operand.vmem [shape: f32[8,1], index: 3, kind: input, shape index: {}]   ;;  %s669_s4 = inlined_call_operand.hbm [shape: f32[2,8,64], index: 4, kind: output, shape index: {}]  }
   0x1   :  { %11 = vsyncpa [#allocation3 + $0x1], 0  ;;  %s560_s15 = smov 0   ;;  %s562_s16 = smov 0  }
   0x2   :  { %s564_s17 = smov 0   ;;  %s566_s18 = smov 0  }
   0x3 LB: > { %s581_s19 = sadd.s32 4294967295, %s529_s18   ;;  %s388_s20 = sadd.s32 4294967294, %s529_s18   ;;  %s529_s18 = sphi %s566_s18, %s675_s18   ;;  %s525_s17 = sphi %s564_s17, %s674_s17   ;;  %s521_s16 = sphi %s562_s16, %s673_s16   ;;  %s517_s15 = sphi %s560_s15, %s672_s15  }
   0x4   : > { %s585_s21 = sadd.s32 1, %s529_s18   ;;  %s113_s22 = sadd.s32 1, %s525_s17 }
   0x5   : > { %s110_s23 = ssub.s32 %s529_s18, %s585_s21  ;;  %p123_p0 = scmp.ne.s32.totalorder %s525_s17, %s521_s16 }
   0x6   : > { %p111_p1 = scmp.eq.s32.totalorder %s110_s23, 0  ;;  %p124_p2 = scmp.eq.s32.totalorder %s581_s19, 1 }
   0x7   : > { %p129_p3 = scmp.ne.s32.totalorder %s521_s16, %s517_s15  ;;  %p130_p4 = scmp.eq.s32.totalorder %s388_s20, 1 }
   0x8   : > { %s596_s24 = scalar_select %p111_p1, %s525_s17, %s113_s22  }
   0x9   : > { %p598_p5 = por %p124_p2, %p123_p0  ;;  %p602_p6 = por %p130_p4, %p129_p3 }
   0xa   : > { %p391_p7 = scmp.ge.s32.totalorder %s529_s18, 1  ;;  %p165_p8 = scmp.lt.s32.totalorder %s529_s18, 3 }
   0xc   : > { %p166_p9 = pnand %p391_p7, %p165_p8 }
   0xd   : > { %p191_p10 = scmp.lt.s32.totalorder (!%p166_p9), %s581_s19, 1  ;;  %s188_s12 = sand.u32 (!%p166_p9), 1, %s521_s16  }
   0xe   : > { %169 = sbr.rel (%p166_p9) target bundleno = 695 (0x2b7), region = 36  ;;  %s392_s13 = sshll.u32 (!%p166_p9), %s188_s12, 3 }
   0xf   : > { %s398_s14 = sshll.u32 (!%p166_p9), %s581_s19, 7  ;;  %s190_s20 = scalar_lea.vmem (!%p166_p9), [#allocation2], %s392_s13 }
  0x10   : > { %s329_s22 = sshll.u32 (!%p166_p9), %s190_s20, 4  ;;  %s316_s29 = scalar_lea.sflag (!%p166_p9), [#allocation3], %s188_s12  ;;  %s330_s22 = int_to_ptr.vmem [resolvable:$true] %s329_s22 }
  0x11   : > { %s469_s30 = scalar_lea.vmem (!%p166_p9), %s330_s22, 128 }
  0x12   : > { %p470_p11 = scmp.ne.s32.totalorder (!%p166_p9), %s330_s22, %s469_s30 }
  0x13   : > { %v531_v0 = vmov 0.0   ;;  %vm532_vm0 = vmmov 0   ;;  %s192_s27 = scalar_select %p191_p10, %s581_s19, 1  ;;  %vm206_vm1 = vcmask 1043456   ;;  %v201_v6 = vld [vmem:[%s666_s1] sm:$0xff]  ;;  %vm202_vm2 = vcmask 293888  }
  0x14   : > { %407 = vmatprep.subr.mxu0 %v531_v0  ;;  %417 = vmatprep.mubr.msk.f32.mxu0 %vm532_vm0, %v531_v0  ;;  %vm280_vm3 = vcmask 523264   ;;  %v533_v15 = vmov 0   ;;  %v291_v19 = vld [vmem:[%s667_s2] sm:$0xff]  ;;  %p471_p12 = pnand %p470_p11, %p598_p5  ;;  %s534_s19 = smov [#allocation2]  }
  0x15   : > { %s420_s28 = smul.u32 40, %s192_s27  ;;  %463 = vset.pattern.permute.xlu1 %v533_v15  ;;  %464 = vset.pattern.permute.xlu0 %v533_v15  ;;  %v301_v22 = vld [vmem:[%s668_s3] sm:$0xff] }
  0x16   : > { %p472_p13 = pneg %p471_p12 }
  0x17   : > { %s195_s5 = scalar_lea.vmem %s665_s0, %s420_s28  ;;  %s629_s28 = scalar_lea.hbm %s669_s4, %s398_s14 }
  0x18   : > { %v200_v1 = vld [vmem:[%s195_s5 + $0x20] sm:$0xf]  ;;  %v199_v2 = vld [vmem:[%s195_s5 + $0x18] sm:$0xff]  ;;  %v198_v3 = vld [vmem:[%s195_s5 + $0x10] sm:$0xff] }
  0x19   : > { %408 = vmatpush3.msk.msra.mxu0 %vm206_vm1, %v200_v1  ;;  %v197_v4 = vld [vmem:[%s195_s5 + $0x8] sm:$0xff]  ;;  %v196_v5 = vld [vmem:[%s195_s5] sm:$0xff]  ;;  %s473_s5 = sshll.u32 %s534_s19, 4  ;;  %s474_s5 = int_to_ptr.vmem [resolvable:$false] %s473_s5 }
  0x1a   : > { %409 = vmatprep.subr.mxu0 %v531_v0  ;;  %s475_s6 = scalar_lea.vmem %s474_s5, 256  ;;  %p476_p0 = scmp.lt.s32.totalorder %s330_s22, %s474_s5 }
  0x1b   : > { %410 = vmatpush3.msra.mxu0 %v199_v2  ;;  %p477_p1 = scmp.lt.s32.totalorder %s475_s6, %s469_s30 }
  0x1c   : > { %411 = vmatprep.subr.mxu0 %v531_v0 }
  0x1d   : > { %412 = vmatpush3.msra.mxu0 %v198_v3  ;;  %p478_p2 = por %p477_p1, %p476_p0 }
  0x1e   : > { %413 = vmatprep.subr.mxu0 %v531_v0 }
  0x1f   : > { %414 = vmatpush3.msra.mxu0 %v197_v4  ;;  %p479_p3 = pnand %p478_p2, %p472_p13 }
  0x20   : > { %415 = vmatprep.subr.mxu0 %v531_v0 }
  0x21   : > { %416 = vmatpush3.msra.mxu0 %v196_v5 }
  0x22   : > { %418 = vmatmul.mubr.msk.f32.vlgmr.msra.gmra.mxu0 %vm202_vm2, %v201_v6 }
  0xe2   : > { %v276_v7 = vpop.f32.mrf.mxu0 }
  0xe3   : > { %v281_v8 = vsel %vm280_vm3, %v276_v7, 0.0 }
  0xe4   : > { %282 = vadd.xlane.f32.xlu0 %v281_v8  ;;  %v419_v9 = vpop.f32.mrf.mxu0 }
 0x16d   : > { %v283_v10 = vpop.xlane.xlu0 %282 }
 0x16e   : > { %v284_v11 = vmul.f32 0.015625, %v283_v10 }
 0x170   : > { %v285_v12 = vsub.f32 %v276_v7, %v284_v11 }
 0x172   : > { %v286_v13 = vmul.f32 %v285_v12, %v285_v12 }
 0x174   : > { %v287_v14 = vsel %vm280_vm3, %v286_v13, 0.0 }
 0x175   : > { %288 = vadd.xlane.f32.xlu0 %v287_v14 }
 0x1fe   : > { %v289_v16 = vpop.xlane.xlu0 %288 }
 0x1ff   : > { %v290_v17 = vmul.f32 0.015625, %v289_v16 }
 0x201   : > { %v292_v18 = vadd.f32 1e-05, %v290_v17 }
 0x203   : > { %465 = vrsqrt.f32 %v292_v18 }
 0x210   : > { %v466_v20 = vpop.eup %465 }
 0x211   : > { %v294_v21 = vmul.f32 %v466_v20, %v291_v19 }
 0x213   : > { %297 = vperm.xlu1 %463, %v294_v21  }
 0x217   : > { %304 = vperm.xlu1 %463, %v301_v22  }
 0x28e   : > { %v298_v23 = vpop.permute.xlu1 %297 }
 0x28f   : > { %v300_v24 = vmul.f32 %v298_v23, %v285_v12 }
 0x292   : > { %v305_v25 = vpop.permute.xlu1 %304 }
 0x293   : > { %v307_v26 = vadd.f32 %v305_v25, %v300_v24 }
 0x295   : > { %v309_v27 = vmin.f32 %v307_v26, 0.0  ;;  %vm308_vm4 = vcmp.gt.f32.partialorder %v307_v26, 0.0 }
 0x297   : > { %v310_v28 = vmul.f32 1.442695, %v309_v27 }
 0x299   : > { %467 = vpow2.f32 %v310_v28 }
 0x2a6   : > { %v468_v29 = vpop.eup %467 }
 0x2a7   : > { %v396_v30 = vadd.f32 -1.0, %v468_v29 }
 0x2a9   : > { %v313_v31 = vsel %vm308_vm4, %v307_v26, %v396_v30 }
 0x2aa   : > { %314 = vst.msk [vmem:[%s190_s20] sm:$0xff] %vm280_vm3, %v313_v31 }
 0x2ab   : > { %482 = shalt.err (!%p479_p3)
}
 0x2ac   : > { %s483_s7 = scalar_lea.hbm %s629_s28, 128  ;;  %s487_s10 = scalar_lea.hbm %s669_s4, 256 }
 0x2ad   : > { %p484_p4 = scmp.ne.s32.totalorder %s629_s28, %s483_s7  ;;  %p488_p9 = scmp.lt.s32.totalorder %s629_s28, %s669_s4 }
 0x2ae   : > { %p489_p10 = scmp.lt.s32.totalorder %s487_s10, %s483_s7 }
 0x2af   : > { %p485_p7 = pnand %p484_p4, %p598_p5 }
 0x2b0   : > { %p490_p11 = por %p489_p10, %p488_p9 }
 0x2b1   : > { %p486_p8 = pneg %p485_p7 }
 0x2b3   : > { %p491_p12 = pnand %p490_p11, %p486_p8 }
 0x2b5   : > { %494 = shalt.err (!%p491_p12)
}
 0x2b6   : > { %421 = dma.vmem_to_hbm [thread:$0]  (%p598_p5), %s330_s22, 128, %s629_s28, %s316_s29  }
 0x2b7 PF: > { %p427_p13 = scmp.ge.s32.totalorder %s529_s18, 2  ;;  %s341_s13 = sand.u32 1, %s517_s15  }
 0x2b8   : > { %s342_s14 = scalar_lea.sflag [#allocation3], %s341_s13 }
 0x2b9   : > { %p424_p0 = pnand %p427_p13, %p602_p6 }
 0x2bb   : > { %p425_p1 = pneg %p424_p0 }
 0x2bd   : > { %512 = dma.done.wait (%p425_p1), %s342_s14, 128  }
 0x2be   : > { %514 = vsyncadd (%p425_p1), %s342_s14, 4294967168  ;;  %p14_p2 = scmp.ge.s32.totalorder %s585_s21, 4   ;;  %s672_s15 = smov %s521_s16 }
 0x2bf   : > { %s673_s16 = smov %s525_s17  ;;  %s674_s17 = smov %s596_s24 }
 0x2c0   : > { %s675_s18 = smov %s585_s21  ;;  %16 = sbr.rel (!%p14_p2) target bundleno = 3 (0x3), region = 71 }
 0x2c5   :  { %347 = vsyncpa [#allocation3], 1 }
 0x2c6   :  { %349 = vsyncpa [#allocation3 + $0x1], 1 }

</bundles_post_ra>
